<compile_context>
chip_gen: v6e
topology: v6e:2x2x1
jax: 0.10.0
libtpu: 0.0.40
codegen_flags: <defaults>
</compile_context>

<pallas_src>
import functools

import jax
import jax.numpy as jnp
from jax.experimental import pallas as pl
from jax.experimental.pallas import tpu as pltpu


def _round_up(x, m):
    return (x + m - 1) // m * m


def _vmem_capacity_bytes():
    """Physical per-core VMEM; conservative fallback is v7x's 64 MiB."""
    try:
        return int(pltpu.get_tpu_info().vmem_capacity_bytes)
    except Exception:
        return 64 * 1024 * 1024


def _gap_matmul_kernel(x_ref, w_ref, b_ref, o_ref, *, inv_hw):
    """Global average pool over the last axis + one fused matmul for all heads.

    x_ref: (TB, C, HW)   NCHW row-major view (no transpose), HW on lanes
    w_ref: (C, SLAB)     folded effective weights (resident, constant index_map)
    b_ref: (1, SLAB)     folded effective bias   (resident)
    o_ref: (TB, SLAB)    concatenated, 128-aligned lane-dense output slab
    """
    x = x_ref[...].astype(jnp.float32)
    feats = jnp.sum(x, axis=-1) * inv_hw                     # (TB, C) GAP
    o_ref[...] = (
        jnp.dot(feats, w_ref[...], preferred_element_type=jnp.float32)
        + b_ref[...]
    ).astype(o_ref.dtype)


def _fold_heads(params):
    """Fold the activation-free Linear->Linear head chain into per-head
    effective weights measured from the pooled features, concatenated along
    the class axis. Valid because there is no nonlinearity anywhere."""
    cols, biases, class_sizes = [], [], []
    A, d = None, None
    for (w1, b1, w2, b2) in params:
        w_eff = jnp.dot(w1, w2, preferred_element_type=jnp.float32)   # (in_t, cls_t)
        c_eff = jnp.dot(b1, w2, preferred_element_type=jnp.float32) + b2
        if A is None:
            A, d = w_eff, c_eff
        else:
            A = jnp.dot(A, w_eff, preferred_element_type=jnp.float32)
            d = jnp.dot(d, w_eff, preferred_element_type=jnp.float32) + c_eff
        cols.append(A)
        biases.append(d)
        class_sizes.append(int(w2.shape[1]))
    return jnp.concatenate(cols, axis=1), jnp.concatenate(biases), class_sizes


def hidden_linear_forward(x_nchw, params):
    """x_nchw: (B, C, H, W); params: list of (w1, b1, w2, b2) per taxon head."""
    B, C, H, W = x_nchw.shape
    HW = H * W
    # Free reshape (row-major view): channels on sublanes, spatial on lanes.
    x = x_nchw.reshape(B, C, HW)

    w_big, c_big, class_sizes = _fold_heads(params)
    total = sum(class_sizes)
    slab = _round_up(max(total, 1), 128)
    if slab > total:
        w_big = jnp.pad(w_big, ((0, 0), (0, slab - total)))
        c_big = jnp.pad(c_big, (0, slab - total))
    w_big = w_big.astype(jnp.float32)
    c_big = c_big.reshape(1, slab).astype(jnp.float32)

    # ---- VMEM-aware batch tiling (padded footprints: sublane 8 / lane 128) ---
    itemsize = 4
    x_row_pad = _round_up(C, 8) * _round_up(HW, 128) * itemsize      # per batch row
    out_row_pad = slab * itemsize
    w_pad = _round_up(C, 8) * slab * itemsize
    b_pad = 8 * slab * itemsize
    weight_bytes = 2 * (w_pad + b_pad)          # assume default 2x buffering (safe)

    cap = _vmem_capacity_bytes()
    budget = max(int(0.60 * cap) - weight_bytes, 4 * 1024 * 1024)

    if B <= 8:
        TB = B                                  # block dim == full dim is legal
    else:
        per_row = 2 * (x_row_pad + out_row_pad)     # double-buffered x + out tiles
        cap_rows = max(8, (budget // per_row) // 8 * 8)
        # keep >= 2 grid steps so v7x megacore + DMA pipelining actually engage
        half = max(8, _round_up((B + 1) // 2, 8))
        TB = min(cap_rows, half)
    grid = (pl.cdiv(B, TB),)

    est = 2 * TB * (x_row_pad + out_row_pad) + weight_bytes
    vmem_limit = int(min(max(2 * est, 32 * 1024 * 1024), int(0.85 * cap)))
    vmem_limit = max(vmem_limit, min(est + (2 << 20), cap))   # never below est

    flops = 2 * B * C * slab + B * C * HW
    bytes_accessed = (B * C * HW + B * slab + int(w_big.size) + int(c_big.size)) * itemsize
    cost = pl.CostEstimate(flops=int(flops), transcendentals=0,
                           bytes_accessed=int(bytes_accessed))

    out_slab = pl.pallas_call(
        functools.partial(_gap_matmul_kernel, inv_hw=1.0 / HW),
        out_shape=jax.ShapeDtypeStruct((B, slab), jnp.float32),
        grid=grid,
        in_specs=[
            pl.BlockSpec((TB, C, HW), lambda i: (i, 0, 0)),   # streamed x tiles
            pl.BlockSpec((C, slab), lambda i: (0, 0)),        # resident folded W
            pl.BlockSpec((1, slab), lambda i: (0, 0)),        # resident folded bias
        ],
        out_specs=pl.BlockSpec((TB, slab), lambda i: (i, 0)),
        compiler_params=pltpu.CompilerParams(
            dimension_semantics=("parallel",),   # megacore sharding on v7x
            vmem_limit_bytes=vmem_limit,
        ),
        cost_estimate=cost,
    )(x, w_big, c_big)

    # Slice the per-taxon outputs back out of the lane-dense slab.
    outs = []
    off = 0
    for c in class_sizes:
        outs.append(out_slab[:, off:off + c])
        off += c
    return outs


def _init_linear(key, fan_in, fan_out):
    # PyTorch nn.Linear default init: U(-1/sqrt(fan_in), 1/sqrt(fan_in)).
    kw, kb = jax.random.split(key)
    bound = 1.0 / jnp.sqrt(jnp.float32(fan_in))
    w = jax.random.uniform(kw, (fan_in, fan_out), jnp.float32, -bound, bound)
    b = jax.random.uniform(kb, (fan_out,), jnp.float32, -bound, bound)
    return w, b


def _reference(x_nchw, params):
    # Unfused reference: GAP backbone tail, then the chained Linear->Linear heads.
    feats = jnp.mean(x_nchw.reshape(x_nchw.shape[0], x_nchw.shape[1], -1), axis=-1)
    cur = feats
    outs = []
    for (w1, b1, w2, b2) in params:
        h = cur @ w1 + b1
        o = h @ w2 + b2
        outs.append(o)
        cur = o
    return outs


if __name__ == "__main__":
    # Small, module-consistent shapes (B chosen so the batch grid has 2 steps).
    B, C, H, W = 16, 32, 8, 8               # in_features = C = 32
    classes_per_taxon = [16, 8]
    hidden_features_per_taxon = [24, 12]

    key = jax.random.PRNGKey(0)
    key, kx = jax.random.split(key)
    x = jax.random.normal(kx, (B, C, H, W), jnp.float32)

    params = []
    in_features = C
    for hidden_num, class_num in zip(hidden_features_per_taxon, classes_per_taxon):
        key, k1, k2 = jax.random.split(key, 3)
        w1, b1 = _init_linear(k1, in_features, hidden_num)
        w2, b2 = _init_linear(k2, hidden_num, class_num)
        params.append((w1, b1, w2, b2))
        in_features = class_num

    outs = hidden_linear_forward(x, params)
    outs = [jax.block_until_ready(o) for o in outs]

    refs = _reference(x, params)
    for o, r in zip(outs, refs):
        assert o.shape == r.shape and o.dtype == r.dtype
        assert jnp.allclose(o, r, atol=1e-4, rtol=1e-4), \
            float(jnp.max(jnp.abs(o - r)))

    print("KERNEL_OK")
</pallas_src>

<mosaic_0001>
module attributes {stable_mosaic.version = 11 : i64} {
  func.func @_gap_matmul_kernel(%arg0: i32, %arg1: memref<8x32x64xf32, #tpu.memory_space<vmem>>, %arg2: memref<32x128xf32, #tpu.memory_space<vmem>>, %arg3: memref<1x128xf32, #tpu.memory_space<vmem>>, %arg4: memref<8x128xf32, #tpu.memory_space<vmem>>) attributes {dimension_semantics = [#tpu.dimension_semantics<parallel>], iteration_bounds = array<i64: 2>, scalar_prefetch = 0 : i64, scratch_operands = 0 : i64, tpu.core_type = #tpu.core_type<tc>, window_params = [{transform_indices = @transform_0, window_bounds = array<i64: 8, 32, 64>}, {pipeline_mode = #tpu.pipeline_mode<synchronous>, transform_indices = @transform_1, window_bounds = array<i64: 32, 128>}, {pipeline_mode = #tpu.pipeline_mode<synchronous>, transform_indices = @transform_2, window_bounds = array<i64: 1, 128>}, {transform_indices = @transform_3, window_bounds = array<i64: 8, 128>}]} {
    %c0 = arith.constant 0 : index
    %c0_0 = arith.constant 0 : index
    %c0_1 = arith.constant 0 : index
    %0 = vector.load %arg1[%c0, %c0_0, %c0_1] : memref<8x32x64xf32, #tpu.memory_space<vmem>>, vector<8x32x64xf32>
    %cst = arith.constant dense<0.000000e+00> : vector<8x32xf32>
    %1 = vector.multi_reduction <add>, %0, %cst [2] : vector<8x32x64xf32> to vector<8x32xf32>
    %cst_2 = arith.constant 1.562500e-02 : f32
    %2 = vector.broadcast %cst_2 : f32 to vector<8x32xf32>
    %3 = arith.mulf %1, %2 : vector<8x32xf32>
    %c0_3 = arith.constant 0 : index
    %c0_4 = arith.constant 0 : index
    %4 = vector.load %arg2[%c0_3, %c0_4] : memref<32x128xf32, #tpu.memory_space<vmem>>, vector<32x128xf32>
    %cst_5 = arith.constant dense<0.000000e+00> : vector<8x128xf32>
    %5 = tpu.matmul %3, %4, %cst_5 {dimension_numbers = #tpu.dot_dimension_numbers<[1], [0], [0], [1], [0, 0, 1, 1], [], []>} : vector<8x32xf32>, vector<32x128xf32>, vector<8x128xf32> -> vector<8x128xf32>
    %c0_6 = arith.constant 0 : index
    %c0_7 = arith.constant 0 : index
    %6 = vector.load %arg3[%c0_6, %c0_7] : memref<1x128xf32, #tpu.memory_space<vmem>>, vector<1x128xf32>
    %7 = vector.broadcast %6 : vector<1x128xf32> to vector<8x128xf32>
    %8 = arith.addf %5, %7 : vector<8x128xf32>
    %c0_8 = arith.constant 0 : index
    %c0_9 = arith.constant 0 : index
    %9 = vector.load %arg4[%c0_8, %c0_9] : memref<8x128xf32, #tpu.memory_space<vmem>>, vector<8x128xf32>
    tpu.vector_store %arg4[%c0_8, %c0_9], %8 {strides = array<i32>} : memref<8x128xf32, #tpu.memory_space<vmem>>, vector<8x128xf32>,
    return
  }
  func.func @transform_0(%arg0: i32) -> (i32, i32, i32) {
    %c0_i32 = arith.constant 0 : i32
    %c0_i32_0 = arith.constant 0 : i32
    %c0_i32_1 = arith.constant 0 : i32
    return %arg0, %c0_i32, %c0_i32_0 : i32, i32, i32
  }
  func.func @transform_1(%arg0: i32) -> (i32, i32) {
    %c0_i32 = arith.constant 0 : i32
    %c0_i32_0 = arith.constant 0 : i32
    %c0_i32_1 = arith.constant 0 : i32
    return %c0_i32, %c0_i32_0 : i32, i32
  }
  func.func @transform_2(%arg0: i32) -> (i32, i32) {
    %c0_i32 = arith.constant 0 : i32
    %c0_i32_0 = arith.constant 0 : i32
    %c0_i32_1 = arith.constant 0 : i32
    return %c0_i32, %c0_i32_0 : i32, i32
  }
  func.func @transform_3(%arg0: i32) -> (i32, i32) {
    %c0_i32 = arith.constant 0 : i32
    %c0_i32_0 = arith.constant 0 : i32
    return %arg0, %c0_i32 : i32, i32
  }
}

</mosaic_0001>

<bundles_post_ra>
// kernel: tpu_custom_call.1
= control target key start
LH: loop header
LB: loop body
LE: loop exit
PB: predicated region body
PF: predicated region fallthrough
CT: control target
= control target key end

     0   :  { %8 = vsyncpa [#allocation3], 0  ;;  %s1321_s0 = inlined_call_operand.hbm [shape: f32[16,32,64], index: 0, kind: input, shape index: {}]   ;;  %s1322_s1 = inlined_call_operand.hbm [shape: f32[32,128], index: 1, kind: input, shape index: {}]   ;;  %s1323_s2 = inlined_call_operand.vmem [shape: f32[1,128], index: 2, kind: input, shape index: {}]   ;;  %s1324_s3 = inlined_call_operand.hbm [shape: f32[16,128], index: 3, kind: output, shape index: {}]  }
   0x1   :  { %10 = vsyncpa [#allocation3 + $0x1], 0 }
   0x2   :  { %11 = vsyncpa [#allocation6], 0 }
   0x3   :  { %12 = vsyncpa [#allocation4], 0 }
   0x4   :  { %14 = vsyncpa [#allocation4 + $0x1], 0  ;;  %s1000_s12 = smov 0   ;;  %s1002_s13 = smov 0  }
   0x5   :  { %s1004_s14 = smov 0   ;;  %s1006_s15 = smov 0  }
   0x6 LB: > { %s1021_s16 = sadd.s32 4294967295, %s971_s15   ;;  %s752_s17 = sadd.s32 4294967294, %s971_s15   ;;  %s971_s15 = sphi %s1006_s15, %s1346_s15   ;;  %s967_s14 = sphi %s1004_s14, %s1345_s14   ;;  %s963_s13 = sphi %s1002_s13, %s1344_s13   ;;  %s959_s12 = sphi %s1000_s12, %s1343_s12  }
   0x7   : > { %p40_p0 = scmp.ne.s32.totalorder %s963_s13, %s959_s12  ;;  %p1325_p1 = scmp.eq.s32.totalorder %s1021_s16, 0 }
   0x8   : > { %p112_p3 = scmp.eq.s32.totalorder %s752_s17, 1  ;;  %p753_p5 = scmp.ge.s32.totalorder %s971_s15, 1 }
   0x9   : > { %p1030_p4 = por %p1325_p1, %p40_p0  ;;  %p119_p7 = scmp.lt.s32.totalorder %s971_s15, 3 }
   0xa   : > { %p1035_p6 = por %p112_p3, %p40_p0  ;;  %s973_s21 = smov [#allocation5]  }
   0xb   : > { %s1329_s18 = scalar_select %p1030_p4, 1, 0 }
   0xc   : > { %s1330_s19 = scalar_select %p1035_p6, 1, 0 }
   0xd   : > { %p1040_p8 = pnand %p753_p5, %p119_p7  ;;  %s131_s22 = sshll.u32 %s973_s21, 4  ;;  %s132_s22 = int_to_ptr.vmem [resolvable:$true] %s131_s22 }
   0xe   : > { %s1054_s24 = sadd.s32 1, %s971_s15   ;;  %s27_s25 = sadd.s32 1, %s967_s14 }
   0xf   : > { %s1331_s20 = scalar_select %p1040_p8, 1, 0 }
  0x10   : > { %p796_p9 = pneg %p1040_p8  ;;  %s24_s26 = ssub.s32 %s971_s15, %s1054_s24 }
  0x11   : > { %s860_s27 = scalar_lea.vmem %s132_s22, 512  ;;  %p868_p5 = scmp.lt.s32.totalorder %s132_s22, %s132_s22 }
  0x12   : > { %p1049_p11 = pnand %p796_p9, %p1325_p1  ;;  %p861_p13 = scmp.ne.s32.totalorder %s132_s22, %s860_s27 }
  0x13   : > { %p869_p7 = scmp.lt.s32.totalorder %s860_s27, %s860_s27 }
  0x14   : > { %p851_p12 = pneg %p1049_p11 }
  0x15   : > { %p870_p10 = por %p869_p7, %p868_p5 }
  0x16   : > { %p863_p0 = pnand %p861_p13, %p851_p12 }
  0x18   : > { %p864_p3 = pneg %p863_p0 }
  0x1a   : > { %p871_p2 = pnand %p870_p10, %p864_p3 }
  0x1c   : > { %874 = shalt.err (!%p871_p2)
}
  0x1d   : > { %s974_s28 = smov 128   ;;  %s975_s29 = smov 8  }
  0x1e   : > { %799 = dma.hbm_to_vmem [thread:$0]  (!%p1049_p11), %s1322_s1, 512, %s132_s22, [#allocation6], %s974_s28, %s974_s28, %s975_s29  }
  0x1f   : > { %p25_p2 = scmp.eq.s32.totalorder %s24_s26, 0  ;;  %p34_p9 = scmp.ne.s32.totalorder %s967_s14, %s963_s13 }
  0x20   : > { %p35_p10 = scmp.eq.s32.totalorder %s971_s15, 0  ;;  %p809_p12 = scmp.lt.s32.totalorder %s971_s15, 2 }
  0x21   : > { %s1074_s5 = scalar_select %p25_p2, %s967_s14, %s27_s25  }
  0x22   : > { %p36_p13 = por %p35_p10, %p34_p9  ;;  %p1333_p0 = scmp.eq.s32.totalorder %s1021_s16, 1 }
  0x23   : > { %s148_s7 = sand.u32 1, %s967_s14   ;;  %s771_s8 = sshll.u32 %s971_s15, 12 }
  0x24   : > { %p1078_p3 = por %p1333_p0, %p34_p9  ;;  %s756_s9 = sshll.u32 %s148_s7, 8 }
  0x25   : > { %s1087_s17 = scalar_lea.hbm %s1321_s0, %s771_s8  ;;  %s152_s21 = scalar_lea.vmem [#allocation2], %s756_s9 }
  0x26   : > { %s1334_s6 = scalar_select %p1078_p3, 1, 0 }
  0x27   : > { %s160_s22 = sshll.u32 %s152_s21, 4  ;;  %p1089_p11 = pnand %p809_p12, %p36_p13  ;;  %s1093_s22 = int_to_ptr.vmem [resolvable:$true] %s160_s22 }
  0x28   : > { %s1095_s25 = scalar_lea.sflag [#allocation3], %s148_s7  ;;  %s875_s26 = scalar_lea.hbm %s1087_s17, 4096 }
  0x29   : > { %p876_p5 = scmp.ne.s32.totalorder %s1087_s17, %s875_s26  ;;  %p877_p7 = pneg %p1089_p11 }
  0x2a   : > { %s880_s4 = scalar_lea.hbm %s1321_s0, 8192  ;;  %p881_p10 = scmp.lt.s32.totalorder %s1087_s17, %s1321_s0 }
  0x2b   : > { %p878_p2 = pnand %p877_p7, %p876_p5  ;;  %p882_p12 = scmp.lt.s32.totalorder %s880_s4, %s875_s26 }
  0x2d   : > { %p879_p9 = pneg %p878_p2  ;;  %p883_p13 = por %p882_p12, %p881_p10 }
  0x2f   : > { %p884_p0 = pnand %p883_p13, %p879_p9 }
  0x31   : > { %887 = shalt.err (!%p884_p0)
}
  0x32   : > { %s888_s7 = scalar_lea.vmem %s1093_s22, 4096  ;;  %s976_s10 = smov [#allocation2]  }
  0x33   : > { %p889_p1 = scmp.ne.s32.totalorder %s1093_s22, %s888_s7  ;;  %s893_s11 = sshll.u32 %s976_s10, 4  ;;  %s894_s11 = int_to_ptr.vmem [resolvable:$false] %s893_s11 }
  0x34   : > { %s895_s21 = scalar_lea.vmem %s894_s11, 8192  ;;  %p896_p2 = scmp.lt.s32.totalorder %s1093_s22, %s894_s11 }
  0x35   : > { %p891_p6 = pnand %p889_p1, %p877_p7  ;;  %p897_p3 = scmp.lt.s32.totalorder %s895_s21, %s888_s7 }
  0x37   : > { %p892_p5 = pneg %p891_p6  ;;  %p898_p4 = por %p897_p3, %p896_p2 }
  0x39   : > { %p899_p8 = pnand %p898_p4, %p892_p5 }
  0x3b   : > { %902 = shalt.err (!%p899_p8)
}
  0x3c   : > { %803 = dma.hbm_to_vmem [thread:$0]  (!%p1089_p11), %s1087_s17, 4096, %s1093_s22, %s1095_s25, %s974_s28, %s974_s28, %s975_s29  }
  0x3d   : > { %p1336_p1 = scmp.ne.s32.totalorder %s1331_s20, 0 }
  0x3e   : > { %s1122_s26 = sand.u32 (!%p1336_p1), 1, %s963_s13   ;;  %p1337_p4 = scmp.ne.s32.totalorder (!%p1336_p1), %s1329_s18, 0 }
  0x3f   : > { %172 = sbr.rel (%p1336_p1) target bundleno = 488 (0x1e8), region = 32  ;;  %s761_s27 = sshll.u32 (!%p1336_p1), %s1122_s26, 8 }
  0x40   : > { %s175_s30 = scalar_lea.sflag (!%p1336_p1), [#allocation3], %s1122_s26  ;;  %s1126_s4 = scalar_lea.vmem (!%p1336_p1), [#allocation2], %s761_s27 }
  0x44   : > { %946 = dma.done.wait (%p1337_p4), %s175_s30, 4096  }
  0x45   : > { %948 = vsyncadd (%p1337_p4), %s175_s30, 4294963200  ;;  %p1338_p6 = scmp.eq.s32.totalorder %s1021_s16, 0 }
  0x47   : > { %950 = dma.done.wait (%p1338_p6), [#allocation6], 512   ;;  %p1339_p8 = pmov %p1338_p6 }
  0x48   : > { %vm238_vm0 = vcmask 523264   ;;  %v210_v0 = vld [vmem:[%s1126_s4 + $0x20] sm:$0xff]  ;;  %v211_v2 = vld [vmem:[%s1126_s4 + $0x28] sm:$0xff]  ;;  %v212_v8 = vld [vmem:[%s1126_s4 + $0x30] sm:$0xff]  ;;  %vm978_vm1 = vmmov 0   ;;  %vm421_vm2 = vcmask 130112  }
  0x49   : > { %952 = vsyncadd (%p1339_p8), [#allocation6], 4294966784  ;;  %v206_v1 = vld [vmem:[%s1126_s4] sm:$0xff]  ;;  %v251_v3 = vsel %vm238_vm0, %v210_v0, 0.0  ;;  %v207_v5 = vld [vmem:[%s1126_s4 + $0x8] sm:$0xff]  ;;  %v254_v6 = vsel %vm238_vm0, %v211_v2, 0.0 }
  0x4a   : > { %v239_v4 = vsel %vm238_vm0, %v206_v1, 0.0  ;;  %252 = vadd.xlane.f32.xlu1 %v251_v3  ;;  %v242_v7 = vsel %vm238_vm0, %v207_v5, 0.0  ;;  %v208_v9 = vld [vmem:[%s1126_s4 + $0x10] sm:$0xff]  ;;  %v257_v10 = vsel %vm238_vm0, %v212_v8, 0.0  ;;  %v215_v12 = vld [vmem:[%s1126_s4 + $0x48] sm:$0xff]  ;;  %v214_v13 = vld [vmem:[%s1126_s4 + $0x40] sm:$0xff] }
  0x4b   : > { %240 = vadd.xlane.f32.xlu0 %v239_v4  ;;  %v245_v11 = vsel %vm238_vm0, %v208_v9, 0.0  ;;  %v266_v14 = vsel %vm238_vm0, %v215_v12, 0.0  ;;  %v263_v15 = vsel %vm238_vm0, %v214_v13, 0.0  ;;  %v213_v16 = vld [vmem:[%s1126_s4 + $0x38] sm:$0xff]  ;;  %v218_v20 = vld [vmem:[%s1126_s4 + $0x60] sm:$0xff]  ;;  %v216_v21 = vld [vmem:[%s1126_s4 + $0x50] sm:$0xff] }
  0x4c   : > { %v209_v17 = vld [vmem:[%s1126_s4 + $0x18] sm:$0xff]  ;;  %v260_v18 = vsel %vm238_vm0, %v213_v16, 0.0  ;;  %v275_v22 = vsel %vm238_vm0, %v218_v20, 0.0  ;;  %v269_v23 = vsel %vm238_vm0, %v216_v21, 0.0  ;;  %v219_v25 = vld [vmem:[%s1126_s4 + $0x68] sm:$0xff]  ;;  %v222_v28 = vld [vmem:[%s1126_s4 + $0x80] sm:$0xff] }
  0x4d   : > { %v248_v19 = vsel %vm238_vm0, %v209_v17, 0.0  ;;  %v217_v24 = vld [vmem:[%s1126_s4 + $0x58] sm:$0xff]  ;;  %v278_v27 = vsel %vm238_vm0, %v219_v25, 0.0  ;;  %v220_v29 = vld [vmem:[%s1126_s4 + $0x70] sm:$0xff]  ;;  %v287_v30 = vsel %vm238_vm0, %v222_v28, 0.0  ;;  %v223_v33 = vld [vmem:[%s1126_s4 + $0x88] sm:$0xff] }
  0x4e   : > { %255 = vadd.xlane.f32.xlu1 %v254_v6  ;;  %v272_v26 = vsel %vm238_vm0, %v217_v24, 0.0  ;;  %v281_v31 = vsel %vm238_vm0, %v220_v29, 0.0  ;;  %v221_v32 = vld [vmem:[%s1126_s4 + $0x78] sm:$0xff]  ;;  %v290_v35 = vsel %vm238_vm0, %v223_v33, 0.0  ;;  %v226_v36 = vld [vmem:[%s1126_s4 + $0xa0] sm:$0xff]  ;;  %v224_v37 = vld [vmem:[%s1126_s4 + $0x90] sm:$0xff] }
  0x4f   : > { %243 = vadd.xlane.f32.xlu0 %v242_v7  ;;  %v284_v34 = vsel %vm238_vm0, %v221_v32, 0.0  ;;  %v299_v38 = vsel %vm238_vm0, %v226_v36, 0.0  ;;  %v293_v39 = vsel %vm238_vm0, %v224_v37, 0.0  ;;  %v225_v40 = vld [vmem:[%s1126_s4 + $0x98] sm:$0xff]  ;;  %v227_v41 = vld [vmem:[%s1126_s4 + $0xa8] sm:$0xff]  ;;  %v230_v44 = vld [vmem:[%s1126_s4 + $0xc0] sm:$0xff] }
  0x50   : > { %v296_v42 = vsel %vm238_vm0, %v225_v40, 0.0  ;;  %v302_v43 = vsel %vm238_vm0, %v227_v41, 0.0  ;;  %v228_v45 = vld [vmem:[%s1126_s4 + $0xb0] sm:$0xff]  ;;  %v311_v46 = vsel %vm238_vm0, %v230_v44, 0.0  ;;  %v229_v48 = vld [vmem:[%s1126_s4 + $0xb8] sm:$0xff]  ;;  %v231_v49 = vld [vmem:[%s1126_s4 + $0xc8] sm:$0xff] }
  0x51   : > { %v305_v47 = vsel %vm238_vm0, %v228_v45, 0.0  ;;  %v308_v50 = vsel %vm238_vm0, %v229_v48, 0.0  ;;  %v314_v51 = vsel %vm238_vm0, %v231_v49, 0.0  ;;  %v234_v52 = vld [vmem:[%s1126_s4 + $0xe0] sm:$0xff]  ;;  %v232_v53 = vld [vmem:[%s1126_s4 + $0xd0] sm:$0xff]  ;;  %v233_v56 = vld [vmem:[%s1126_s4 + $0xd8] sm:$0xff] }
  0x52   : > { %258 = vadd.xlane.f32.xlu1 %v257_v10  ;;  %v323_v54 = vsel %vm238_vm0, %v234_v52, 0.0  ;;  %v317_v55 = vsel %vm238_vm0, %v232_v53, 0.0  ;;  %v235_v57 = vld [vmem:[%s1126_s4 + $0xe8] sm:$0xff]  ;;  %v320_v58 = vsel %vm238_vm0, %v233_v56, 0.0  ;;  %v236_v60 = vld [vmem:[%s1126_s4 + $0xf0] sm:$0xff]  ;;  %v237_v61 = vld [vmem:[%s1126_s4 + $0xf8] sm:$0xff] }
  0x53   : > { %246 = vadd.xlane.f32.xlu0 %v245_v11  ;;  %v326_v59 = vsel %vm238_vm0, %v235_v57, 0.0  ;;  %v329_v62 = vsel %vm238_vm0, %v236_v60, 0.0  ;;  %v332_v63 = vsel %vm238_vm0, %v237_v61, 0.0  ;;  %v977_v0 = vmov 0.0   ;;  %v370_v1 = vld [vmem:[#allocation5 + $0x18] sm:$0xff]  ;;  %v369_v2 = vld [vmem:[#allocation5 + $0x10] sm:$0xff] }
  0x54   : > { %777 = vmatprep.subr.mxu0 %v977_v0  ;;  %v368_v3 = vld [vmem:[#allocation5 + $0x8] sm:$0xff]  ;;  %v367_v4 = vld [vmem:[#allocation5] sm:$0xff]  ;;  %785 = vmatprep.mubr.msk.f32.mxu0 %vm978_vm1, %v977_v0  ;;  %vm428_vm3 = vcmask 195712   ;;  %vm435_vm4 = vcmask 261312   ;;  %vm570_vm5 = vcmask 1041409   ;;  %vm572_vm6 = vcmask 1042434  }
  0x55   : > { %778 = vmatpush3.msra.mxu0 %v370_v1  ;;  %vm574_vm7 = vcmask 1043459   ;;  %vm576_vm8 = vcmask 1044484   ;;  %vm578_vm9 = vcmask 1045509   ;;  %vm580_vm10 = vcmask 1046534   ;;  %s763_s18 = sshll.u32 %s1122_s26, 3  ;;  %s767_s29 = sshll.u32 %s1021_s16, 7 }
  0x56   : > { %267 = vadd.xlane.f32.xlu1 %v266_v14  ;;  %779 = vmatprep.subr.mxu0 %v977_v0  ;;  %vm582_vm11 = vcmask 1047559   ;;  %vm584_vm12 = vcmask 261120   ;;  %s204_s17 = scalar_lea.vmem [#allocation7], %s763_s18  ;;  %s1284_s8 = scalar_lea.hbm %s1324_s3, %s767_s29 }
  0x57   : > { %264 = vadd.xlane.f32.xlu0 %v263_v15  ;;  %780 = vmatpush3.msra.mxu0 %v369_v2  ;;  %s672_s22 = sshll.u32 %s204_s17, 4  ;;  %s659_s9 = scalar_lea.sflag [#allocation4], %s1122_s26  ;;  %s673_s22 = int_to_ptr.vmem [resolvable:$true] %s672_s22 }
  0x58   : > { %781 = vmatprep.subr.mxu0 %v977_v0  ;;  %s903_s7 = scalar_lea.vmem %s673_s22, 128  ;;  %p1340_p11 = scmp.ne.s32.totalorder %s1334_s6, 0 }
  0x59   : > { %782 = vmatpush3.msra.mxu0 %v368_v3  ;;  %p904_p3 = scmp.ne.s32.totalorder %s673_s22, %s903_s7  ;;  %s979_s10 = smov [#allocation7]  }
  0x5a   : > { %261 = vadd.xlane.f32.xlu1 %v260_v18  ;;  %783 = vmatprep.subr.mxu0 %v977_v0  ;;  %s907_s16 = sshll.u32 %s979_s10, 4  ;;  %s908_s16 = int_to_ptr.vmem [resolvable:$false] %s907_s16 }
  0x5b   : > { %249 = vadd.xlane.f32.xlu0 %v248_v19  ;;  %784 = vmatpush3.msra.mxu0 %v367_v4  ;;  %v410_v19 = vlaneseq  ;;  %p905_p7 = pnand %p904_p3, %p1340_p11  ;;  %s909_s11 = scalar_lea.vmem %s908_s16, 256 }
  0x5c   : > { %p910_p10 = scmp.lt.s32.totalorder %s673_s22, %s908_s16  ;;  %p911_p12 = scmp.lt.s32.totalorder %s909_s11, %s903_s7 }
  0x5d   : > { %p906_p9 = pneg %p905_p7 }
  0x5e   : > { %276 = vadd.xlane.f32.xlu1 %v275_v22  ;;  %v411_v22 = vand.u32 127, %v410_v19  ;;  %p912_p13 = por %p911_p12, %p910_p10 }
  0x5f   : > { %270 = vadd.xlane.f32.xlu0 %v269_v23  ;;  %v413_v23 = vshrl.u32 %v410_v19, 7 }
  0x60   : > { %v430_v28 = vadd.s32 4294967272, %v411_v22  ;;  %p913_p0 = pnand %p912_p13, %p906_p9 }
  0x61   : > { %v1202_v29 = vsub.s32 %v411_v22, %v413_v23 }
  0x62   : > { %273 = vadd.xlane.f32.xlu1 %v272_v26  ;;  %v416_v26 = vadd.s32 4294967288, %v411_v22  ;;  %v1210_v40 = vsub.s32 %v430_v28, %v413_v23 }
  0x63   : > { %279 = vadd.xlane.f32.xlu0 %v278_v27  ;;  %v423_v27 = vadd.s32 4294967280, %v411_v22 }
  0x64   : > { %v1206_v33 = vsub.s32 %v416_v26, %v413_v23 }
  0x65   : > { %v1208_v36 = vsub.s32 %v423_v27, %v413_v23 }
  0x66   : > { %288 = vadd.xlane.f32.xlu1 %v287_v30 }
  0x67   : > { %282 = vadd.xlane.f32.xlu0 %v281_v31 }
  0x6a   : > { %285 = vadd.xlane.f32.xlu1 %v284_v34 }
  0x6b   : > { %291 = vadd.xlane.f32.xlu0 %v290_v35 }
  0x6e   : > { %300 = vadd.xlane.f32.xlu1 %v299_v38 }
  0x6f   : > { %294 = vadd.xlane.f32.xlu0 %v293_v39 }
  0x72   : > { %297 = vadd.xlane.f32.xlu1 %v296_v42 }
  0x73   : > { %303 = vadd.xlane.f32.xlu0 %v302_v43 }
  0x76   : > { %312 = vadd.xlane.f32.xlu1 %v311_v46 }
  0x77   : > { %306 = vadd.xlane.f32.xlu0 %v305_v47 }
  0x7a   : > { %309 = vadd.xlane.f32.xlu1 %v308_v50 }
  0x7b   : > { %315 = vadd.xlane.f32.xlu0 %v314_v51 }
  0x7e   : > { %324 = vadd.xlane.f32.xlu1 %v323_v54 }
  0x7f   : > { %318 = vadd.xlane.f32.xlu0 %v317_v55 }
  0x82   : > { %321 = vadd.xlane.f32.xlu1 %v320_v58 }
  0x83   : > { %327 = vadd.xlane.f32.xlu0 %v326_v59 }
  0x86   : > { %333 = vadd.xlane.f32.xlu1 %v332_v63 }
  0x87   : > { %330 = vadd.xlane.f32.xlu0 %v329_v62 }
  0xd3   : > { %v253_v5 = vpop.xlane.xlu1 %252 }
  0xd4   : > { %v241_v6 = vpop.xlane.xlu0 %240  ;;  %v339_v32 = vmul.f32 0.015625, %v253_v5 }
  0xd5   : > { %v335_v39 = vmul.f32 0.015625, %v241_v6 }
  0xd6   : > { %v440_v45 = vrot.slane %v339_v32, %v1202_v29 }
  0xd7   : > { %v256_v7 = vpop.xlane.xlu1 %255  ;;  %v415_v52 = vrot.slane %v335_v39, %v1202_v29 }
  0xd8   : > { %v244_v8 = vpop.xlane.xlu0 %243  ;;  %v340_v34 = vmul.f32 0.015625, %v256_v7 }
  0xd9   : > { %v336_v35 = vmul.f32 0.015625, %v244_v8 }
  0xda   : > { %v444_v46 = vrot.slane %v340_v34, %v1206_v33 }
  0xdb   : > { %v259_v9 = vpop.xlane.xlu1 %258  ;;  %v420_v47 = vrot.slane %v336_v35, %v1206_v33 }
  0xdc   : > { %v247_v10 = vpop.xlane.xlu0 %246  ;;  %v341_v37 = vmul.f32 0.015625, %v259_v9  ;;  %v445_v58 = vsel %vm421_vm2, %v444_v46, %v440_v45 }
  0xdd   : > { %v337_v38 = vmul.f32 0.015625, %v247_v10  ;;  %v422_v59 = vsel %vm421_vm2, %v420_v47, %v415_v52 }
  0xde   : > { %v449_v48 = vrot.slane %v341_v37, %v1208_v36 }
  0xdf   : > { %v268_v11 = vpop.xlane.xlu1 %267  ;;  %v427_v49 = vrot.slane %v337_v38, %v1208_v36 }
  0xe0   : > { %v265_v12 = vpop.xlane.xlu0 %264  ;;  %v344_v50 = vmul.f32 0.015625, %v268_v11  ;;  %v450_v61 = vsel %vm428_vm3, %v449_v48, %v445_v58 }
  0xe1   : > { %v343_v51 = vmul.f32 0.015625, %v265_v12  ;;  %v429_v62 = vsel %vm428_vm3, %v427_v49, %v422_v59 }
  0xe2   : > { %v463_v63 = vrot.slane %v344_v50, %v1206_v33 }
  0xe3   : > { %v262_v13 = vpop.xlane.xlu1 %261  ;;  %v459_v0 = vrot.slane %v343_v51, %v1202_v29 }
  0xe4   : > { %v250_v14 = vpop.xlane.xlu0 %249  ;;  %v342_v41 = vmul.f32 0.015625, %v262_v13 }
  0xe5   : > { %v338_v42 = vmul.f32 0.015625, %v250_v14  ;;  %v464_v10 = vsel %vm421_vm2, %v463_v63, %v459_v0 }
  0xe6   : > { %v454_v53 = vrot.slane %v342_v41, %v1210_v40 }
  0xe7   : > { %v277_v15 = vpop.xlane.xlu1 %276  ;;  %v434_v54 = vrot.slane %v338_v42, %v1210_v40 }
  0xe8   : > { %v271_v16 = vpop.xlane.xlu0 %270  ;;  %v455_v1 = vsel %vm435_vm4, %v454_v53, %v450_v61  ;;  %v347_v8 = vmul.f32 0.015625, %v277_v15 }
  0xe9   : > { %v345_v55 = vmul.f32 0.015625, %v271_v16  ;;  %v436_v2 = vsel %vm435_vm4, %v434_v54, %v429_v62 }
  0xea   : > { %v571_v11 = vsel %vm570_vm5, %v455_v1, %v436_v2  ;;  %v478_v26 = vrot.slane %v347_v8, %v1202_v29 }
  0xeb   : > { %v274_v17 = vpop.xlane.xlu1 %273  ;;  %v468_v3 = vrot.slane %v345_v55, %v1208_v36 }
  0xec   : > { %v280_v18 = vpop.xlane.xlu0 %279  ;;  %v346_v60 = vmul.f32 0.015625, %v274_v17 }
  0xed   : > { %v348_v4 = vmul.f32 0.015625, %v280_v18  ;;  %v469_v13 = vsel %vm428_vm3, %v468_v3, %v464_v10 }
  0xee   : > { %v473_v9 = vrot.slane %v346_v60, %v1210_v40 }
  0xef   : > { %v289_v20 = vpop.xlane.xlu1 %288  ;;  %v482_v14 = vrot.slane %v348_v4, %v1206_v33 }
  0xf0   : > { %v1200_v21 = vpop.xlane.xlu0 %282  ;;  %v351_v12 = vmul.f32 0.015625, %v289_v20  ;;  %v474_v20 = vsel %vm435_vm4, %v473_v9, %v469_v13 }
  0xf1   : > { %v349_v16 = vmul.f32 0.015625, %v1200_v21  ;;  %v573_v3 = vsel %vm572_vm6, %v474_v20, %v571_v11 }
  0xf2   : > { %v497_v32 = vrot.slane %v351_v12, %v1202_v29 }
  0xf3   : > { %v286_v24 = vpop.xlane.xlu1 %285  ;;  %v487_v35 = vrot.slane %v349_v16, %v1208_v36 }
  0xf4   : > { %v292_v25 = vpop.xlane.xlu0 %291  ;;  %v350_v18 = vmul.f32 0.015625, %v286_v24  ;;  %v483_v24 = vsel %vm421_vm2, %v482_v14, %v478_v26 }
  0xf5   : > { %v352_v5 = vmul.f32 0.015625, %v292_v25  ;;  %v488_v53 = vsel %vm428_vm3, %v487_v35, %v483_v24 }
  0xf6   : > { %v492_v39 = vrot.slane %v350_v18, %v1210_v40 }
  0xf7   : > { %v1204_v30 = vpop.xlane.xlu1 %300  ;;  %v501_v19 = vrot.slane %v352_v5, %v1206_v33 }
  0xf8   : > { %v295_v31 = vpop.xlane.xlu0 %294  ;;  %v355_v21 = vmul.f32 0.015625, %v1204_v30 }
  0xf9   : > { %v353_v17 = vmul.f32 0.015625, %v295_v31  ;;  %v502_v41 = vsel %vm421_vm2, %v501_v19, %v497_v32 }
  0xfa   : > { %v516_v49 = vrot.slane %v355_v21, %v1202_v29 }
  0xfb   : > { %v298_v43 = vpop.xlane.xlu1 %297  ;;  %v506_v37 = vrot.slane %v353_v17, %v1208_v36 }
  0xfc   : > { %v304_v44 = vpop.xlane.xlu0 %303  ;;  %v354_v15 = vmul.f32 0.015625, %v298_v43 }
  0xfd   : > { %v356_v22 = vmul.f32 0.015625, %v304_v44  ;;  %v507_v54 = vsel %vm428_vm3, %v506_v37, %v502_v41 }
  0xfe   : > { %v511_v42 = vrot.slane %v354_v15, %v1210_v40 }
  0xff   : > { %v313_v56 = vpop.xlane.xlu1 %312  ;;  %v520_v43 = vrot.slane %v356_v22, %v1206_v33 }
 0x100   : > { %v307_v57 = vpop.xlane.xlu0 %306  ;;  %v359_v38 = vmul.f32 0.015625, %v313_v56  ;;  %v512_v58 = vsel %vm435_vm4, %v511_v42, %v507_v54 }
 0x101   : > { %v357_v27 = vmul.f32 0.015625, %v307_v57  ;;  %v493_v57 = vsel %vm435_vm4, %v492_v39, %v488_v53  ;;  %v521_v59 = vsel %vm421_vm2, %v520_v43, %v516_v49 }
 0x102   : > { %v535_v55 = vrot.slane %v359_v38, %v1202_v29 }
 0x103   : > { %v310_v6 = vpop.xlane.xlu1 %309  ;;  %v525_v45 = vrot.slane %v357_v27, %v1208_v36 }
 0x104   : > { %v316_v7 = vpop.xlane.xlu0 %315  ;;  %v358_v31 = vmul.f32 0.015625, %v310_v6 }
 0x105   : > { %v360_v28 = vmul.f32 0.015625, %v316_v7  ;;  %v526_v63 = vsel %vm428_vm3, %v525_v45, %v521_v59  ;;  %v575_v7 = vsel %vm574_vm7, %v493_v57, %v573_v3 }
 0x106   : > { %v530_v50 = vrot.slane %v358_v31, %v1210_v40  ;;  %v577_v10 = vsel %vm576_vm8, %v512_v58, %v575_v7 }
 0x107   : > { %v325_v23 = vpop.xlane.xlu1 %324  ;;  %v539_v46 = vrot.slane %v360_v28, %v1206_v33 }
 0x108   : > { %v319_v25 = vpop.xlane.xlu0 %318  ;;  %v363_v51 = vmul.f32 0.015625, %v325_v23  ;;  %v531_v4 = vsel %vm435_vm4, %v530_v50, %v526_v63 }
 0x109   : > { %v361_v34 = vmul.f32 0.015625, %v319_v25  ;;  %v540_v0 = vsel %vm421_vm2, %v539_v46, %v535_v55 }
 0x10a   : > { %v554_v5 = vrot.slane %v363_v51, %v1202_v29  ;;  %v579_v29 = vsel %vm578_vm9, %v531_v4, %v577_v10 }
 0x10b   : > { %v322_v30 = vpop.xlane.xlu1 %321  ;;  %v544_v52 = vrot.slane %v361_v34, %v1208_v36 }
 0x10c   : > { %v328_v44 = vpop.xlane.xlu0 %327  ;;  %v362_v47 = vmul.f32 0.015625, %v322_v30 }
 0x10d   : > { %v364_v48 = vmul.f32 0.015625, %v328_v44  ;;  %v545_v6 = vsel %vm428_vm3, %v544_v52, %v540_v0 }
 0x10e   : > { %v549_v56 = vrot.slane %v362_v47, %v1210_v40 }
 0x10f   : > { %v558_v60 = vrot.slane %v364_v48, %v1206_v33  ;;  %v334_v62 = vpop.xlane.xlu1 %333 }
 0x110   : > { %v331_v61 = vpop.xlane.xlu0 %330  ;;  %v366_v2 = vmul.f32 0.015625, %v334_v62  ;;  %v550_v33 = vsel %vm435_vm4, %v549_v56, %v545_v6 }
 0x111   : > { %v365_v1 = vmul.f32 0.015625, %v331_v61  ;;  %v559_v11 = vsel %vm421_vm2, %v558_v60, %v554_v5  ;;  %v581_v14 = vsel %vm580_vm10, %v550_v33, %v579_v29 }
 0x112   : > { %v568_v9 = vrot.slane %v366_v2, %v1210_v40 }
 0x113   : > { %v563_v8 = vrot.slane %v365_v1, %v1208_v36  ;;  %v764_v36 = vld [vmem:[%s1323_s2] ss:$0 sm:$0xff] }
 0x115   : > { %v564_v12 = vsel %vm428_vm3, %v563_v8, %v559_v11 }
 0x116   : > { %v569_v13 = vsel %vm435_vm4, %v568_v9, %v564_v12 }
 0x117   : > { %v583_v16 = vsel %vm582_vm11, %v569_v13, %v581_v14 }
 0x118   : > { %786 = vmatmul.mubr.msk.f32.vlgmr.msra.gmra.mxu0 %vm584_vm12, %v583_v16 }
 0x1d8   : > { %v653_v40 = vpop.f32.mrf.mxu0 }
 0x1d9   : > { %v654_v17 = vadd.f32 %v764_v36, %v653_v40 }
 0x1da   : > { %v787_v18 = vpop.f32.mrf.mxu0 }
 0x1db   : > { %657 = vst [vmem:[%s204_s17] sm:$0xff] %v654_v17 }
 0x1dc   : > { %916 = shalt.err (!%p913_p0)
}
 0x1dd   : > { %s917_s21 = scalar_lea.hbm %s1284_s8, 128  ;;  %s921_s30 = scalar_lea.hbm %s1324_s3, 256 }
 0x1de   : > { %p918_p5 = scmp.ne.s32.totalorder %s1284_s8, %s917_s21  ;;  %p922_p4 = scmp.lt.s32.totalorder %s1284_s8, %s1324_s3 }
 0x1df   : > { %p923_p6 = scmp.lt.s32.totalorder %s921_s30, %s917_s21 }
 0x1e0   : > { %p919_p2 = pnand %p918_p5, %p1340_p11 }
 0x1e1   : > { %p924_p8 = por %p923_p6, %p922_p4 }
 0x1e2   : > { %p920_p1 = pneg %p919_p2 }
 0x1e4   : > { %p925_p3 = pnand %p924_p8, %p920_p1 }
 0x1e6   : > { %928 = shalt.err (!%p925_p3)
}
 0x1e7   : > { %794 = dma.vmem_to_hbm [thread:$0]  (%p1340_p11), %s673_s22, 128, %s1284_s8, %s659_s9  }
 0x1e8 PF: > { %s684_s20 = sand.u32 1, %s959_s12   ;;  %p1341_p7 = scmp.ne.s32.totalorder %s1330_s19, 0 }
 0x1e9   : > { %p1342_p9 = scmp.ge.s32.totalorder %s971_s15, 2  ;;  %s685_s28 = scalar_lea.sflag [#allocation4], %s684_s20 }
 0x1eb   : > { %p805_p10 = pnand %p1342_p9, %p1341_p7 }
 0x1ed   : > { %p806_p12 = pneg %p805_p10 }
 0x1ef   : > { %954 = dma.done.wait (%p806_p12), %s685_s28, 128  }
 0x1f0   : > { %956 = vsyncadd (%p806_p12), %s685_s28, 4294967168  ;;  %p17_p13 = scmp.ge.s32.totalorder %s1054_s24, 4   ;;  %s1343_s12 = smov %s963_s13 }
 0x1f1   : > { %s1344_s13 = smov %s967_s14  ;;  %s1345_s14 = smov %s1074_s5 }
 0x1f2   : > { %s1346_s15 = smov %s1054_s24  ;;  %19 = sbr.rel (!%p17_p13) target bundleno = 6 (0x6), region = 81 }
 0x1f7   :  { %690 = vsyncpa [#allocation3], 1 }
 0x1f8   :  { %692 = vsyncpa [#allocation3 + $0x1], 1 }
 0x1f9   :  { %693 = vsyncpa [#allocation6], 1 }
 0x1fa   :  { %694 = vsyncpa [#allocation4], 1 }
 0x1fb   :  { %696 = vsyncpa [#allocation4 + $0x1], 1 }

</bundles_post_ra>
